<compile_context>
chip_gen: v7x
topology: tpu7x:2x2x1
jax: 0.10.0
libtpu: 0.0.40
codegen_flags: <defaults>
</compile_context>

<pallas_src>
import numpy as np

import jax
import jax.numpy as jnp
from jax import lax
from jax.experimental import pallas as pl
from jax.experimental.pallas import tpu as pltpu

# ------------------------- "settings" (synthetic, small) -------------------------
DECODER_INPUT_SIZE = 512     # small stand-in for 96000 samples
DECODER_HIDDEN_SIZE = 32
CONV_KERNEL_SIZE = 8
CONV_STRIDE = 4
BATCH = 2

C1, C2, C3 = 32, 64, 128     # conv channel counts (fixed by the module)
LANES = 128
FOLD = 16                    # input samples per folded row = 4 phases * stride 4


def conv_lengths(L0, k=CONV_KERNEL_SIZE, s=CONV_STRIDE):
    L1 = (L0 - k) // s + 1
    L2 = (L1 - k) // s + 1
    L3 = (L2 - k) // s + 1
    return L1, L2, L3


# ------------------------------- fused Pallas kernel ------------------------------
def _bat_decoder_kernel(x_ref, w1_ref, b1_ref, w2_ref, b2_ref, w3_ref, b3_ref,
                        w4_ref, b4_ref, w5_ref, b5_ref,
                        out_ref, h1_ref, h2_ref, h3_ref):
    """Whole BatDecoder forward for one batch element, entirely in VMEM.

    Packed layouts (rows = packed time, 128 lanes):
      h1: row r, lane 32*p + c  = conv1 output at time 4r+p, channel c   (p=0..3)
      h2: row r, lane 64*p + co = conv2 output at time 2r+p, channel co  (p=0..1)
      h3: row u, lane co        = conv3 output at time u,    channel co
    """
    f32, bf16 = jnp.float32, jnp.bfloat16
    n1 = h1_ref.shape[0]            # packed conv1 rows (= 4*L3 + 5)
    n2 = h2_ref.shape[0]            # packed conv2 rows (= 2*L3 + 2)
    n3 = h3_ref.shape[0]            # conv3 rows        (= L3)

    # ---- conv1 + ReLU: two K=16 dots writing the 4-phase-packed h1 directly ----
    x = x_ref[0]                                                # (L0//16, 16) f32
    pre = jnp.dot(x[0:n1, :].astype(bf16), w1_ref[0], preferred_element_type=f32)
    pre = pre + jnp.dot(x[1:n1 + 1, :].astype(bf16), w1_ref[1],
                        preferred_element_type=f32)
    h1_ref[...] = jnp.maximum(pre + b1_ref[...], 0.0)           # (n1, 128)

    # ---- conv2 + ReLU: three dense-K (n2,128)@(128,128) dots, 2-phase packed out ----
    pre = jnp.dot(h1_ref[pl.ds(0, n2, stride=2), :].astype(bf16), w2_ref[0],
                  preferred_element_type=f32)
    pre = pre + jnp.dot(h1_ref[pl.ds(1, n2, stride=2), :].astype(bf16), w2_ref[1],
                        preferred_element_type=f32)
    pre = pre + jnp.dot(h1_ref[pl.ds(2, n2, stride=2), :].astype(bf16), w2_ref[2],
                        preferred_element_type=f32)
    h2_ref[...] = jnp.maximum(pre + b2_ref[...], 0.0)           # (n2, 128)

    # ---- conv3 + ReLU: four dense-K (L3,128)@(128,128) dots ----
    pre = jnp.dot(h2_ref[pl.ds(0, n3, stride=2), :].astype(bf16), w3_ref[0],
                  preferred_element_type=f32)
    for d in range(1, 4):
        pre = pre + jnp.dot(h2_ref[pl.ds(d, n3, stride=2), :].astype(bf16),
                            w3_ref[d], preferred_element_type=f32)
    h3_ref[...] = jnp.maximum(pre + b3_ref[...], 0.0)           # (L3, 128)

    # ---- fc1 + ReLU (torch C-major flatten folded into w4's layout) ----
    H = w4_ref.shape[2]

    def fc1_body(l, acc):
        row = h3_ref[pl.ds(l, 1), :].astype(bf16)               # (1, 128)
        return acc + jnp.dot(row, w4_ref[l], preferred_element_type=f32)

    acc = lax.fori_loop(0, n3, fc1_body, jnp.zeros((1, H), f32))
    h4 = jnp.maximum(acc + b4_ref[...], 0.0)                    # (1, H) f32

    # ---- fc2 + sigmoid (128-lane output; lane 0 is the detection) ----
    logit = jnp.dot(h4.astype(bf16), w5_ref[...], preferred_element_type=f32)
    out_ref[0] = jax.nn.sigmoid(logit + b5_ref[...])            # (1, 128)


def bat_decoder_forward(prep, x):
    """x: (B, 1, L0) float32 -> detection probability (B, 1)."""
    B = x.shape[0]
    L0 = x.shape[-1]
    k, s = CONV_KERNEL_SIZE, CONV_STRIDE
    assert k == 8 and s == 4, "packed layouts hard-code kernel=8, stride=4"
    _, _, L3 = conv_lengths(L0)

    # Packed row counts (only rows actually consumed downstream are computed).
    n3 = L3                   # conv3 outputs
    n2 = 2 * L3 + 2           # 2-phase packed conv2 rows needed by conv3
    n1 = 2 * n2 + 1           # 4-phase packed conv1 rows needed by conv2
    assert L0 % FOLD == 0 and (n1 + 1) * FOLD <= L0, "input too short for fold"

    # Pure layout fold (no gather, no duplication): x_folded[b, r, q] = x[b, 0, 16r+q]
    x_folded = x.reshape(B, L0 // FOLD, FOLD).astype(jnp.float32)

    out = pl.pallas_call(
        _bat_decoder_kernel,
        out_shape=jax.ShapeDtypeStruct((B, 1, LANES), jnp.float32),
        grid=(B,),
        in_specs=[
            pl.BlockSpec((1, L0 // FOLD, FOLD), lambda b: (b, 0, 0)),   # folded audio
            pl.BlockSpec((2, FOLD, LANES), lambda b: (0, 0, 0)),        # conv1 w (packed)
            pl.BlockSpec((1, LANES), lambda b: (0, 0)),                 # conv1 b (4x tiled)
            pl.BlockSpec((3, LANES, LANES), lambda b: (0, 0, 0)),       # conv2 w (packed)
            pl.BlockSpec((1, LANES), lambda b: (0, 0)),                 # conv2 b (2x tiled)
            pl.BlockSpec((4, LANES, LANES), lambda b: (0, 0, 0)),       # conv3 w (packed)
            pl.BlockSpec((1, LANES), lambda b: (0, 0)),                 # conv3 b
            pl.BlockSpec((L3, LANES, DECODER_HIDDEN_SIZE),
                         lambda b: (0, 0, 0)),                          # fc1 w (unpadded out)
            pl.BlockSpec((1, DECODER_HIDDEN_SIZE), lambda b: (0, 0)),   # fc1 b
            pl.BlockSpec((DECODER_HIDDEN_SIZE, LANES), lambda b: (0, 0)),  # fc2 w
            pl.BlockSpec((1, LANES), lambda b: (0, 0)),                 # fc2 b
        ],
        out_specs=pl.BlockSpec((1, 1, LANES), lambda b: (b, 0, 0)),
        scratch_shapes=[
            pltpu.VMEM((n1, LANES), jnp.float32),                       # packed conv1 out
            pltpu.VMEM((n2, LANES), jnp.float32),                       # packed conv2 out
            pltpu.VMEM((n3, LANES), jnp.float32),                       # conv3 out
        ],
        compiler_params=pltpu.CompilerParams(
            dimension_semantics=("parallel",)),
    )(x_folded, prep["w1"], prep["b1"], prep["w2"], prep["b2"], prep["w3"],
      prep["b3"], prep["w4"], prep["b4"], prep["w5"], prep["b5"])

    return out[:, 0, :1]                                                # (B, 1)


# -------------------- one-off host-side parameter preparation ---------------------
def prepare_inference_params(params):
    """Repack torch-layout params into the phase-packed bf16 kernel layout."""
    k = CONV_KERNEL_SIZE
    H = DECODER_HIDDEN_SIZE
    _, _, L3 = conv_lengths(DECODER_INPUT_SIZE)

    w1 = np.asarray(params["conv1_w"], np.float32)      # (32, 1, 8)
    w2 = np.asarray(params["conv2_w"], np.float32)      # (64, 32, 8)
    w3 = np.asarray(params["conv3_w"], np.float32)      # (128, 64, 8)
    fc1_w = np.asarray(params["fc1_w"], np.float32)     # (H, 128*L3)
    fc2_w = np.asarray(params["fc2_w"], np.float32)     # (1, H)

    # conv1 -> (2, 16, 128):  W1[a, q, 32p+c] = w1[c, 0, 16a + q - 4p]
    W1 = np.zeros((2, FOLD, LANES), np.float32)
    for p in range(4):
        for j in range(k):
            a, qq = divmod(4 * p + j, FOLD)
            W1[a, qq, 32 * p:32 * (p + 1)] = w1[:, 0, j]
    b1 = np.tile(np.asarray(params["conv1_b"], np.float32), 4)[None, :]

    # conv2 -> 3 (128,128) slabs over 2-phase-packed output columns.
    #   A[32p+ci, co]  = w2[co, ci, p]      (taps 0..3)
    #   Bm[32p+ci, co] = w2[co, ci, p + 4]  (taps 4..7)
    A = np.zeros((LANES, C2), np.float32)
    Bm = np.zeros((LANES, C2), np.float32)
    for p in range(4):
        A[32 * p:32 * (p + 1), :] = w2[:, :, p].T
        Bm[32 * p:32 * (p + 1), :] = w2[:, :, p + 4].T
    W2 = np.zeros((3, LANES, LANES), np.float32)
    W2[0, :, :C2] = A                     # even h1 rows -> phase-0 outputs
    W2[1, :, :C2] = Bm                    # odd  h1 rows -> phase-0 outputs
    W2[1, :, C2:] = A                     # odd  h1 rows -> phase-1 outputs
    W2[2, :, C2:] = Bm                    # next even h1 rows -> phase-1 outputs
    b2 = np.tile(np.asarray(params["conv2_b"], np.float32), 2)[None, :]

    # conv3 -> 4 dense (128,128) slabs:  W3[d, 64p+ci, co] = w3[co, ci, 2d+p]
    W3 = np.zeros((4, LANES, LANES), np.float32)
    for d in range(4):
        for p in range(2):
            W3[d, 64 * p:64 * (p + 1), :] = w3[:, :, 2 * d + p].T
    b3 = np.asarray(params["conv3_b"], np.float32)[None, :]

    # fc1: torch C-major flatten (index c*L3 + l) folded into the column order:
    #   W4[l, c, m] = fc1_w[m, c*L3 + l];   output dim kept at H (no lane pad).
    W4 = fc1_w.reshape(H, C3, L3).transpose(2, 1, 0)            # (L3, 128, H)
    b4 = np.asarray(params["fc1_b"], np.float32)[None, :]       # (1, H)

    # fc2: (H, 128) with column 0 holding the weights; bias in lane 0.
    W5 = np.zeros((H, LANES), np.float32)
    W5[:, 0] = fc2_w[0]
    b5 = np.zeros((1, LANES), np.float32)
    b5[0, 0] = float(np.asarray(params["fc2_b"])[0])

    bf = lambda a: jnp.asarray(a, jnp.bfloat16)
    f32 = lambda a: jnp.asarray(a, jnp.float32)
    return dict(w1=bf(W1), b1=f32(b1), w2=bf(W2), b2=f32(b2),
                w3=bf(W3), b3=f32(b3), w4=bf(W4), b4=f32(b4),
                w5=bf(W5), b5=f32(b5))


# ------------------------------ parameter init -------------------------------------
def xavier_uniform(key, shape, fan_in, fan_out):
    bound = (6.0 / (fan_in + fan_out)) ** 0.5
    return jax.random.uniform(key, shape, jnp.float32, -bound, bound)


def init_params(key):
    k = CONV_KERNEL_SIZE
    _, _, L3 = conv_lengths(DECODER_INPUT_SIZE)
    conv_output_size = C3 * L3

    keys = jax.random.split(key, 5)
    return {
        "conv1_w": xavier_uniform(keys[0], (C1, 1, k), fan_in=1 * k, fan_out=C1 * k),
        "conv1_b": jnp.zeros((C1,), jnp.float32),
        "conv2_w": xavier_uniform(keys[1], (C2, C1, k), fan_in=C1 * k, fan_out=C2 * k),
        "conv2_b": jnp.zeros((C2,), jnp.float32),
        "conv3_w": xavier_uniform(keys[2], (C3, C2, k), fan_in=C2 * k, fan_out=C3 * k),
        "conv3_b": jnp.zeros((C3,), jnp.float32),
        "fc1_w": xavier_uniform(keys[3], (DECODER_HIDDEN_SIZE, conv_output_size),
                                fan_in=conv_output_size, fan_out=DECODER_HIDDEN_SIZE),
        "fc1_b": jnp.zeros((DECODER_HIDDEN_SIZE,), jnp.float32),
        "fc2_w": xavier_uniform(keys[4], (1, DECODER_HIDDEN_SIZE),
                                fan_in=DECODER_HIDDEN_SIZE, fan_out=1),
        "fc2_b": jnp.zeros((1,), jnp.float32),
    }


# ---------------------------- pure-JAX reference -----------------------------------
def bat_decoder_reference(params, x):
    def conv1d(h, w, b):
        y = jax.lax.conv_general_dilated(
            h, w, window_strides=(CONV_STRIDE,), padding="VALID",
            dimension_numbers=("NCH", "OIH", "NCH"))
        return y + b[None, :, None]

    h = jax.nn.relu(conv1d(x, params["conv1_w"], params["conv1_b"]))
    h = jax.nn.relu(conv1d(h, params["conv2_w"], params["conv2_b"]))
    h = jax.nn.relu(conv1d(h, params["conv3_w"], params["conv3_b"]))
    h = h.reshape(h.shape[0], -1)                               # torch .view: C-major
    h = jax.nn.relu(h @ params["fc1_w"].T + params["fc1_b"])
    return jax.nn.sigmoid(h @ params["fc2_w"].T + params["fc2_b"])


if __name__ == "__main__":
    key = jax.random.PRNGKey(0)
    pkey, xkey = jax.random.split(key)
    params = init_params(pkey)
    prep = prepare_inference_params(params)
    x = jax.random.normal(xkey, (BATCH, 1, DECODER_INPUT_SIZE), jnp.float32)

    fwd = jax.jit(bat_decoder_forward)
    out = jax.block_until_ready(fwd(prep, x))
    ref = jax.block_until_ready(bat_decoder_reference(params, x))

    assert out.shape == (BATCH, 1), out.shape
    assert bool(jnp.all((out >= 0.0) & (out <= 1.0)))
    assert bool(jnp.allclose(out, ref, atol=2e-2)), (out, ref)
    print("KERNEL_OK")
</pallas_src>

<mosaic_0001>
module attributes {stable_mosaic.version = 11 : i64} {
  func.func @_bat_decoder_kernel(%arg0: i32, %arg1: memref<1x32x16xf32, #tpu.memory_space<vmem>>, %arg2: memref<2x16x128xbf16, #tpu.memory_space<vmem>>, %arg3: memref<1x128xf32, #tpu.memory_space<vmem>>, %arg4: memref<3x128x128xbf16, #tpu.memory_space<vmem>>, %arg5: memref<1x128xf32, #tpu.memory_space<vmem>>, %arg6: memref<4x128x128xbf16, #tpu.memory_space<vmem>>, %arg7: memref<1x128xf32, #tpu.memory_space<vmem>>, %arg8: memref<6x128x32xbf16, #tpu.memory_space<vmem>>, %arg9: memref<1x32xf32, #tpu.memory_space<vmem>>, %arg10: memref<32x128xbf16, #tpu.memory_space<vmem>>, %arg11: memref<1x128xf32, #tpu.memory_space<vmem>>, %arg12: memref<1x1x128xf32, #tpu.memory_space<vmem>>, %arg13: memref<29x128xf32, #tpu.memory_space<vmem>>, %arg14: memref<14x128xf32, #tpu.memory_space<vmem>>, %arg15: memref<6x128xf32, #tpu.memory_space<vmem>>) attributes {dimension_semantics = [#tpu.dimension_semantics<parallel>], iteration_bounds = array<i64: 2>, scalar_prefetch = 0 : i64, scratch_operands = 3 : i64, tpu.core_type = #tpu.core_type<tc>, window_params = [{transform_indices = @transform_0, window_bounds = array<i64: 1, 32, 16>}, {pipeline_mode = #tpu.pipeline_mode<synchronous>, transform_indices = @transform_1, window_bounds = array<i64: 2, 16, 128>}, {pipeline_mode = #tpu.pipeline_mode<synchronous>, transform_indices = @transform_2, window_bounds = array<i64: 1, 128>}, {pipeline_mode = #tpu.pipeline_mode<synchronous>, transform_indices = @transform_3, window_bounds = array<i64: 3, 128, 128>}, {pipeline_mode = #tpu.pipeline_mode<synchronous>, transform_indices = @transform_4, window_bounds = array<i64: 1, 128>}, {pipeline_mode = #tpu.pipeline_mode<synchronous>, transform_indices = @transform_5, window_bounds = array<i64: 4, 128, 128>}, {pipeline_mode = #tpu.pipeline_mode<synchronous>, transform_indices = @transform_6, window_bounds = array<i64: 1, 128>}, {pipeline_mode = #tpu.pipeline_mode<synchronous>, transform_indices = @transform_7, window_bounds = array<i64: 6, 128, 32>}, {pipeline_mode = #tpu.pipeline_mode<synchronous>, transform_indices = @transform_8, window_bounds = array<i64: 1, 32>}, {pipeline_mode = #tpu.pipeline_mode<synchronous>, transform_indices = @transform_9, window_bounds = array<i64: 32, 128>}, {pipeline_mode = #tpu.pipeline_mode<synchronous>, transform_indices = @transform_10, window_bounds = array<i64: 1, 128>}, {transform_indices = @transform_11, window_bounds = array<i64: 1, 1, 128>}]} {
    %c0 = arith.constant 0 : index
    %c0_0 = arith.constant 0 : index
    %c0_1 = arith.constant 0 : index
    %0 = vector.load %arg1[%c0, %c0_0, %c0_1] : memref<1x32x16xf32, #tpu.memory_space<vmem>>, vector<1x32x16xf32>
    %1 = vector.shape_cast %0 : vector<1x32x16xf32> to vector<32x16xf32>
    %2 = vector.extract_strided_slice %1 {offsets = [0, 0], sizes = [29, 16], strides = [1, 1]} : vector<32x16xf32> to vector<29x16xf32>
    %3 = arith.truncf %2 : vector<29x16xf32> to vector<29x16xbf16>
    %c0_2 = arith.constant 0 : index
    %c0_3 = arith.constant 0 : index
    %c0_4 = arith.constant 0 : index
    %4 = vector.load %arg2[%c0_2, %c0_3, %c0_4] : memref<2x16x128xbf16, #tpu.memory_space<vmem>>, vector<1x16x128xbf16>
    %5 = vector.shape_cast %4 : vector<1x16x128xbf16> to vector<16x128xbf16>
    %cst = arith.constant dense<0.000000e+00> : vector<29x128xf32>
    %6 = tpu.matmul %3, %5, %cst {dimension_numbers = #tpu.dot_dimension_numbers<[1], [0], [0], [1], [0, 0, 1, 1], [], []>} : vector<29x16xbf16>, vector<16x128xbf16>, vector<29x128xf32> -> vector<29x128xf32>
    %7 = vector.extract_strided_slice %1 {offsets = [1, 0], sizes = [29, 16], strides = [1, 1]} : vector<32x16xf32> to vector<29x16xf32>
    %8 = arith.truncf %7 : vector<29x16xf32> to vector<29x16xbf16>
    %c1 = arith.constant 1 : index
    %c0_5 = arith.constant 0 : index
    %c0_6 = arith.constant 0 : index
    %9 = vector.load %arg2[%c1, %c0_5, %c0_6] : memref<2x16x128xbf16, #tpu.memory_space<vmem>>, vector<1x16x128xbf16>
    %10 = vector.shape_cast %9 : vector<1x16x128xbf16> to vector<16x128xbf16>
    %cst_7 = arith.constant dense<0.000000e+00> : vector<29x128xf32>
    %11 = tpu.matmul %8, %10, %cst_7 {dimension_numbers = #tpu.dot_dimension_numbers<[1], [0], [0], [1], [0, 0, 1, 1], [], []>} : vector<29x16xbf16>, vector<16x128xbf16>, vector<29x128xf32> -> vector<29x128xf32>
    %12 = arith.addf %6, %11 : vector<29x128xf32>
    %c0_8 = arith.constant 0 : index
    %c0_9 = arith.constant 0 : index
    %13 = vector.load %arg3[%c0_8, %c0_9] : memref<1x128xf32, #tpu.memory_space<vmem>>, vector<1x128xf32>
    %14 = vector.broadcast %13 : vector<1x128xf32> to vector<29x128xf32>
    %15 = arith.addf %12, %14 : vector<29x128xf32>
    %cst_10 = arith.constant 0.000000e+00 : f32
    %16 = vector.broadcast %cst_10 : f32 to vector<29x128xf32>
    %17 = arith.maximumf %15, %16 : vector<29x128xf32>
    %c0_11 = arith.constant 0 : index
    %c0_12 = arith.constant 0 : index
    %18 = vector.load %arg13[%c0_11, %c0_12] : memref<29x128xf32, #tpu.memory_space<vmem>>, vector<29x128xf32>
    tpu.vector_store %arg13[%c0_11, %c0_12], %17 {strides = array<i32>} : memref<29x128xf32, #tpu.memory_space<vmem>>, vector<29x128xf32>,
    %c0_13 = arith.constant 0 : index
    %c0_14 = arith.constant 0 : index
    %19 = tpu.strided_load %arg13[%c0_13, %c0_14] {strides = array<i32: 2, 1>} : memref<29x128xf32, #tpu.memory_space<vmem>>, vector<14x128xf32>
    %20 = arith.truncf %19 : vector<14x128xf32> to vector<14x128xbf16>
    %c0_15 = arith.constant 0 : index
    %c0_16 = arith.constant 0 : index
    %c0_17 = arith.constant 0 : index
    %21 = vector.load %arg4[%c0_15, %c0_16, %c0_17] : memref<3x128x128xbf16, #tpu.memory_space<vmem>>, vector<1x128x128xbf16>
    %22 = vector.shape_cast %21 : vector<1x128x128xbf16> to vector<128x128xbf16>
    %cst_18 = arith.constant dense<0.000000e+00> : vector<14x128xf32>
    %23 = tpu.matmul %20, %22, %cst_18 {dimension_numbers = #tpu.dot_dimension_numbers<[1], [0], [0], [1], [0, 0, 1, 1], [], []>} : vector<14x128xbf16>, vector<128x128xbf16>, vector<14x128xf32> -> vector<14x128xf32>
    %c1_19 = arith.constant 1 : index
    %c0_20 = arith.constant 0 : index
    %24 = tpu.strided_load %arg13[%c1_19, %c0_20] {strides = array<i32: 2, 1>} : memref<29x128xf32, #tpu.memory_space<vmem>>, vector<14x128xf32>
    %25 = arith.truncf %24 : vector<14x128xf32> to vector<14x128xbf16>
    %c1_21 = arith.constant 1 : index
    %c0_22 = arith.constant 0 : index
    %c0_23 = arith.constant 0 : index
    %26 = vector.load %arg4[%c1_21, %c0_22, %c0_23] : memref<3x128x128xbf16, #tpu.memory_space<vmem>>, vector<1x128x128xbf16>
    %27 = vector.shape_cast %26 : vector<1x128x128xbf16> to vector<128x128xbf16>
    %cst_24 = arith.constant dense<0.000000e+00> : vector<14x128xf32>
    %28 = tpu.matmul %25, %27, %cst_24 {dimension_numbers = #tpu.dot_dimension_numbers<[1], [0], [0], [1], [0, 0, 1, 1], [], []>} : vector<14x128xbf16>, vector<128x128xbf16>, vector<14x128xf32> -> vector<14x128xf32>
    %29 = arith.addf %23, %28 : vector<14x128xf32>
    %c2 = arith.constant 2 : index
    %c0_25 = arith.constant 0 : index
    %30 = tpu.strided_load %arg13[%c2, %c0_25] {strides = array<i32: 2, 1>} : memref<29x128xf32, #tpu.memory_space<vmem>>, vector<14x128xf32>
    %31 = arith.truncf %30 : vector<14x128xf32> to vector<14x128xbf16>
    %c2_26 = arith.constant 2 : index
    %c0_27 = arith.constant 0 : index
    %c0_28 = arith.constant 0 : index
    %32 = vector.load %arg4[%c2_26, %c0_27, %c0_28] : memref<3x128x128xbf16, #tpu.memory_space<vmem>>, vector<1x128x128xbf16>
    %33 = vector.shape_cast %32 : vector<1x128x128xbf16> to vector<128x128xbf16>
    %cst_29 = arith.constant dense<0.000000e+00> : vector<14x128xf32>
    %34 = tpu.matmul %31, %33, %cst_29 {dimension_numbers = #tpu.dot_dimension_numbers<[1], [0], [0], [1], [0, 0, 1, 1], [], []>} : vector<14x128xbf16>, vector<128x128xbf16>, vector<14x128xf32> -> vector<14x128xf32>
    %35 = arith.addf %29, %34 : vector<14x128xf32>
    %c0_30 = arith.constant 0 : index
    %c0_31 = arith.constant 0 : index
    %36 = vector.load %arg5[%c0_30, %c0_31] : memref<1x128xf32, #tpu.memory_space<vmem>>, vector<1x128xf32>
    %37 = vector.broadcast %36 : vector<1x128xf32> to vector<14x128xf32>
    %38 = arith.addf %35, %37 : vector<14x128xf32>
    %cst_32 = arith.constant 0.000000e+00 : f32
    %39 = vector.broadcast %cst_32 : f32 to vector<14x128xf32>
    %40 = arith.maximumf %38, %39 : vector<14x128xf32>
    %c0_33 = arith.constant 0 : index
    %c0_34 = arith.constant 0 : index
    %41 = vector.load %arg14[%c0_33, %c0_34] : memref<14x128xf32, #tpu.memory_space<vmem>>, vector<14x128xf32>
    tpu.vector_store %arg14[%c0_33, %c0_34], %40 {strides = array<i32>} : memref<14x128xf32, #tpu.memory_space<vmem>>, vector<14x128xf32>,
    %c0_35 = arith.constant 0 : index
    %c0_36 = arith.constant 0 : index
    %42 = tpu.strided_load %arg14[%c0_35, %c0_36] {strides = array<i32: 2, 1>} : memref<14x128xf32, #tpu.memory_space<vmem>>, vector<6x128xf32>
    %43 = arith.truncf %42 : vector<6x128xf32> to vector<6x128xbf16>
    %c0_37 = arith.constant 0 : index
    %c0_38 = arith.constant 0 : index
    %c0_39 = arith.constant 0 : index
    %44 = vector.load %arg6[%c0_37, %c0_38, %c0_39] : memref<4x128x128xbf16, #tpu.memory_space<vmem>>, vector<1x128x128xbf16>
    %45 = vector.shape_cast %44 : vector<1x128x128xbf16> to vector<128x128xbf16>
    %cst_40 = arith.constant dense<0.000000e+00> : vector<6x128xf32>
    %46 = tpu.matmul %43, %45, %cst_40 {dimension_numbers = #tpu.dot_dimension_numbers<[1], [0], [0], [1], [0, 0, 1, 1], [], []>} : vector<6x128xbf16>, vector<128x128xbf16>, vector<6x128xf32> -> vector<6x128xf32>
    %c1_41 = arith.constant 1 : index
    %c0_42 = arith.constant 0 : index
    %47 = tpu.strided_load %arg14[%c1_41, %c0_42] {strides = array<i32: 2, 1>} : memref<14x128xf32, #tpu.memory_space<vmem>>, vector<6x128xf32>
    %48 = arith.truncf %47 : vector<6x128xf32> to vector<6x128xbf16>
    %c1_43 = arith.constant 1 : index
    %c0_44 = arith.constant 0 : index
    %c0_45 = arith.constant 0 : index
    %49 = vector.load %arg6[%c1_43, %c0_44, %c0_45] : memref<4x128x128xbf16, #tpu.memory_space<vmem>>, vector<1x128x128xbf16>
    %50 = vector.shape_cast %49 : vector<1x128x128xbf16> to vector<128x128xbf16>
    %cst_46 = arith.constant dense<0.000000e+00> : vector<6x128xf32>
    %51 = tpu.matmul %48, %50, %cst_46 {dimension_numbers = #tpu.dot_dimension_numbers<[1], [0], [0], [1], [0, 0, 1, 1], [], []>} : vector<6x128xbf16>, vector<128x128xbf16>, vector<6x128xf32> -> vector<6x128xf32>
    %52 = arith.addf %46, %51 : vector<6x128xf32>
    %c2_47 = arith.constant 2 : index
    %c0_48 = arith.constant 0 : index
    %53 = tpu.strided_load %arg14[%c2_47, %c0_48] {strides = array<i32: 2, 1>} : memref<14x128xf32, #tpu.memory_space<vmem>>, vector<6x128xf32>
    %54 = arith.truncf %53 : vector<6x128xf32> to vector<6x128xbf16>
    %c2_49 = arith.constant 2 : index
    %c0_50 = arith.constant 0 : index
    %c0_51 = arith.constant 0 : index
    %55 = vector.load %arg6[%c2_49, %c0_50, %c0_51] : memref<4x128x128xbf16, #tpu.memory_space<vmem>>, vector<1x128x128xbf16>
    %56 = vector.shape_cast %55 : vector<1x128x128xbf16> to vector<128x128xbf16>
    %cst_52 = arith.constant dense<0.000000e+00> : vector<6x128xf32>
    %57 = tpu.matmul %54, %56, %cst_52 {dimension_numbers = #tpu.dot_dimension_numbers<[1], [0], [0], [1], [0, 0, 1, 1], [], []>} : vector<6x128xbf16>, vector<128x128xbf16>, vector<6x128xf32> -> vector<6x128xf32>
    %58 = arith.addf %52, %57 : vector<6x128xf32>
    %c3 = arith.constant 3 : index
    %c0_53 = arith.constant 0 : index
    %59 = tpu.strided_load %arg14[%c3, %c0_53] {strides = array<i32: 2, 1>} : memref<14x128xf32, #tpu.memory_space<vmem>>, vector<6x128xf32>
    %60 = arith.truncf %59 : vector<6x128xf32> to vector<6x128xbf16>
    %c3_54 = arith.constant 3 : index
    %c0_55 = arith.constant 0 : index
    %c0_56 = arith.constant 0 : index
    %61 = vector.load %arg6[%c3_54, %c0_55, %c0_56] : memref<4x128x128xbf16, #tpu.memory_space<vmem>>, vector<1x128x128xbf16>
    %62 = vector.shape_cast %61 : vector<1x128x128xbf16> to vector<128x128xbf16>
    %cst_57 = arith.constant dense<0.000000e+00> : vector<6x128xf32>
    %63 = tpu.matmul %60, %62, %cst_57 {dimension_numbers = #tpu.dot_dimension_numbers<[1], [0], [0], [1], [0, 0, 1, 1], [], []>} : vector<6x128xbf16>, vector<128x128xbf16>, vector<6x128xf32> -> vector<6x128xf32>
    %64 = arith.addf %58, %63 : vector<6x128xf32>
    %c0_58 = arith.constant 0 : index
    %c0_59 = arith.constant 0 : index
    %65 = vector.load %arg7[%c0_58, %c0_59] : memref<1x128xf32, #tpu.memory_space<vmem>>, vector<1x128xf32>
    %66 = vector.broadcast %65 : vector<1x128xf32> to vector<6x128xf32>
    %67 = arith.addf %64, %66 : vector<6x128xf32>
    %cst_60 = arith.constant 0.000000e+00 : f32
    %68 = vector.broadcast %cst_60 : f32 to vector<6x128xf32>
    %69 = arith.maximumf %67, %68 : vector<6x128xf32>
    %c0_61 = arith.constant 0 : index
    %c0_62 = arith.constant 0 : index
    %70 = vector.load %arg15[%c0_61, %c0_62] : memref<6x128xf32, #tpu.memory_space<vmem>>, vector<6x128xf32>
    tpu.vector_store %arg15[%c0_61, %c0_62], %69 {strides = array<i32>} : memref<6x128xf32, #tpu.memory_space<vmem>>, vector<6x128xf32>,
    %cst_63 = arith.constant 0.000000e+00 : f32
    %71 = vector.broadcast %cst_63 : f32 to vector<1x32xf32>
    %c0_i32 = arith.constant 0 : i32
    %c6_i32 = arith.constant 6 : i32
    %72 = arith.addi %c0_i32, %c6_i32 : i32
    %c1_i32 = arith.constant 1 : i32
    %73 = scf.for %arg16 = %c0_i32 to %72 step %c1_i32 iter_args(%arg17 = %71) -> (vector<1x32xf32>)  : i32 {
      %91 = arith.index_cast %arg16 : i32 to index
      %c0_77 = arith.constant 0 : index
      %92 = vector.load %arg15[%91, %c0_77] : memref<6x128xf32, #tpu.memory_space<vmem>>, vector<1x128xf32>
      %93 = arith.truncf %92 : vector<1x128xf32> to vector<1x128xbf16>
      %94 = arith.index_cast %arg16 : i32 to index
      %c0_78 = arith.constant 0 : index
      %c0_79 = arith.constant 0 : index
      %95 = vector.load %arg8[%94, %c0_78, %c0_79] : memref<6x128x32xbf16, #tpu.memory_space<vmem>>, vector<1x128x32xbf16>
      %96 = vector.shape_cast %95 : vector<1x128x32xbf16> to vector<128x32xbf16>
      %cst_80 = arith.constant dense<0.000000e+00> : vector<1x32xf32>
      %97 = tpu.matmul %93, %96, %cst_80 {dimension_numbers = #tpu.dot_dimension_numbers<[1], [0], [0], [1], [0, 0, 1, 1], [], []>} : vector<1x128xbf16>, vector<128x32xbf16>, vector<1x32xf32> -> vector<1x32xf32>
      %98 = arith.addf %arg17, %97 : vector<1x32xf32>
      scf.yield %98 : vector<1x32xf32>
    }
    %c6_i32_64 = arith.constant 6 : i32
    %c0_65 = arith.constant 0 : index
    %c0_66 = arith.constant 0 : index
    %74 = vector.load %arg9[%c0_65, %c0_66] : memref<1x32xf32, #tpu.memory_space<vmem>>, vector<1x32xf32>
    %75 = arith.addf %73, %74 : vector<1x32xf32>
    %cst_67 = arith.constant 0.000000e+00 : f32
    %76 = vector.broadcast %cst_67 : f32 to vector<1x32xf32>
    %77 = arith.maximumf %75, %76 : vector<1x32xf32>
    %78 = arith.truncf %77 : vector<1x32xf32> to vector<1x32xbf16>
    %c0_68 = arith.constant 0 : index
    %c0_69 = arith.constant 0 : index
    %79 = vector.load %arg10[%c0_68, %c0_69] : memref<32x128xbf16, #tpu.memory_space<vmem>>, vector<32x128xbf16>
    %cst_70 = arith.constant dense<0.000000e+00> : vector<1x128xf32>
    %80 = tpu.matmul %78, %79, %cst_70 {dimension_numbers = #tpu.dot_dimension_numbers<[1], [0], [0], [1], [0, 0, 1, 1], [], []>} : vector<1x32xbf16>, vector<32x128xbf16>, vector<1x128xf32> -> vector<1x128xf32>
    %c0_71 = arith.constant 0 : index
    %c0_72 = arith.constant 0 : index
    %81 = vector.load %arg11[%c0_71, %c0_72] : memref<1x128xf32, #tpu.memory_space<vmem>>, vector<1x128xf32>
    %82 = arith.addf %80, %81 : vector<1x128xf32>
    %83 = arith.negf %82 : vector<1x128xf32>
    %84 = math.exp %83 : vector<1x128xf32>
    %cst_73 = arith.constant 1.000000e+00 : f32
    %85 = vector.broadcast %cst_73 : f32 to vector<1x128xf32>
    %86 = arith.addf %85, %84 : vector<1x128xf32>
    %87 = arith.divf %85, %86 : vector<1x128xf32>
    %c0_74 = arith.constant 0 : index
    %c0_75 = arith.constant 0 : index
    %c0_76 = arith.constant 0 : index
    %88 = vector.load %arg12[%c0_74, %c0_75, %c0_76] : memref<1x1x128xf32, #tpu.memory_space<vmem>>, vector<1x1x128xf32>
    %89 = vector.shape_cast %88 : vector<1x1x128xf32> to vector<1x128xf32>
    %90 = vector.shape_cast %87 : vector<1x128xf32> to vector<1x1x128xf32>
    tpu.vector_store %arg12[%c0_74, %c0_75, %c0_76], %90 {strides = array<i32>} : memref<1x1x128xf32, #tpu.memory_space<vmem>>, vector<1x1x128xf32>,
    return
  }
  func.func @transform_0(%arg0: i32) -> (i32, i32, i32) {
    %c0_i32 = arith.constant 0 : i32
    %c0_i32_0 = arith.constant 0 : i32
    %c0_i32_1 = arith.constant 0 : i32
    return %arg0, %c0_i32, %c0_i32_0 : i32, i32, i32
  }
  func.func @transform_1(%arg0: i32) -> (i32, i32, i32) {
    %c0_i32 = arith.constant 0 : i32
    %c0_i32_0 = arith.constant 0 : i32
    %c0_i32_1 = arith.constant 0 : i32
    %c0_i32_2 = arith.constant 0 : i32
    return %c0_i32, %c0_i32_0, %c0_i32_1 : i32, i32, i32
  }
  func.func @transform_2(%arg0: i32) -> (i32, i32) {
    %c0_i32 = arith.constant 0 : i32
    %c0_i32_0 = arith.constant 0 : i32
    %c0_i32_1 = arith.constant 0 : i32
    return %c0_i32, %c0_i32_0 : i32, i32
  }
  func.func @transform_3(%arg0: i32) -> (i32, i32, i32) {
    %c0_i32 = arith.constant 0 : i32
    %c0_i32_0 = arith.constant 0 : i32
    %c0_i32_1 = arith.constant 0 : i32
    %c0_i32_2 = arith.constant 0 : i32
    return %c0_i32, %c0_i32_0, %c0_i32_1 : i32, i32, i32
  }
  func.func @transform_4(%arg0: i32) -> (i32, i32) {
    %c0_i32 = arith.constant 0 : i32
    %c0_i32_0 = arith.constant 0 : i32
    %c0_i32_1 = arith.constant 0 : i32
    return %c0_i32, %c0_i32_0 : i32, i32
  }
  func.func @transform_5(%arg0: i32) -> (i32, i32, i32) {
    %c0_i32 = arith.constant 0 : i32
    %c0_i32_0 = arith.constant 0 : i32
    %c0_i32_1 = arith.constant 0 : i32
    %c0_i32_2 = arith.constant 0 : i32
    return %c0_i32, %c0_i32_0, %c0_i32_1 : i32, i32, i32
  }
  func.func @transform_6(%arg0: i32) -> (i32, i32) {
    %c0_i32 = arith.constant 0 : i32
    %c0_i32_0 = arith.constant 0 : i32
    %c0_i32_1 = arith.constant 0 : i32
    return %c0_i32, %c0_i32_0 : i32, i32
  }
  func.func @transform_7(%arg0: i32) -> (i32, i32, i32) {
    %c0_i32 = arith.constant 0 : i32
    %c0_i32_0 = arith.constant 0 : i32
    %c0_i32_1 = arith.constant 0 : i32
    %c0_i32_2 = arith.constant 0 : i32
    return %c0_i32, %c0_i32_0, %c0_i32_1 : i32, i32, i32
  }
  func.func @transform_8(%arg0: i32) -> (i32, i32) {
    %c0_i32 = arith.constant 0 : i32
    %c0_i32_0 = arith.constant 0 : i32
    %c0_i32_1 = arith.constant 0 : i32
    return %c0_i32, %c0_i32_0 : i32, i32
  }
  func.func @transform_9(%arg0: i32) -> (i32, i32) {
    %c0_i32 = arith.constant 0 : i32
    %c0_i32_0 = arith.constant 0 : i32
    %c0_i32_1 = arith.constant 0 : i32
    return %c0_i32, %c0_i32_0 : i32, i32
  }
  func.func @transform_10(%arg0: i32) -> (i32, i32) {
    %c0_i32 = arith.constant 0 : i32
    %c0_i32_0 = arith.constant 0 : i32
    %c0_i32_1 = arith.constant 0 : i32
    return %c0_i32, %c0_i32_0 : i32, i32
  }
  func.func @transform_11(%arg0: i32) -> (i32, i32, i32) {
    %c0_i32 = arith.constant 0 : i32
    %c0_i32_0 = arith.constant 0 : i32
    %c0_i32_1 = arith.constant 0 : i32
    return %arg0, %c0_i32, %c0_i32_0 : i32, i32, i32
  }
}

</mosaic_0001>

<bundles_post_ra>
// kernel: bat_decoder_forward.1
= control target key start
LH: loop header
LB: loop body
LE: loop exit
PB: predicated region body
PF: predicated region fallthrough
CT: control target
= control target key end

     0   :  { %s2212_s17 = smov 0   ;;  %s2524_s0 = inlined_call_operand.vmem [shape: f32[2,32,16], index: 0, kind: input, shape index: {}]   ;;  %s2525_s1 = inlined_call_operand.vmem [shape: bf16[2,16,128], index: 1, kind: input, shape index: {}]   ;;  %s2526_s2 = inlined_call_operand.vmem [shape: f32[1,128], index: 2, kind: input, shape index: {}]   ;;  %s2527_s3 = inlined_call_operand.vmem [shape: bf16[3,128,128], index: 3, kind: input, shape index: {}]   ;;  %s2528_s4 = inlined_call_operand.vmem [shape: f32[1,128], index: 4, kind: input, shape index: {}]   ;;  %s2529_s5 = inlined_call_operand.vmem [shape: bf16[4,128,128], index: 5, kind: input, shape index: {}]   ;;  %s2530_s6 = inlined_call_operand.vmem [shape: f32[1,128], index: 6, kind: input, shape index: {}]   ;;  %s2531_s7 = inlined_call_operand.vmem [shape: bf16[6,128,32], index: 7, kind: input, shape index: {}]   ;;  %s2532_s8 = inlined_call_operand.vmem [shape: f32[1,32], index: 8, kind: input, shape index: {}]   ;;  %s2533_s9 = inlined_call_operand.vmem [shape: bf16[32,128], index: 9, kind: input, shape index: {}]   ;;  %s2534_s10 = inlined_call_operand.vmem [shape: f32[1,128], index: 10, kind: input, shape index: {}]   ;;  %s2535_s11 = inlined_call_operand.vmem [shape: f32[2,1,128], index: 11, kind: output, shape index: {}]  }
   0x1 LB: > { %s1587_s18 = sadd.s32 4294967295, %s2138_s17   ;;  %p1591_p0 = scmp.ge.s32.totalorder %s2138_s17, 1  ;;  %s2138_s17 = sphi %s2212_s17, %s21_s17  }
   0x2   : > { %p337_p1 = scmp.lt.s32.totalorder %s2138_s17, 3 }
   0x4   : > { %p338_p2 = pnand %p1591_p0, %p337_p1 }
   0x5   : > { %v2052_v0 = vld [vmem:[%s2525_s1 + $0x8] sm:$0xff] (!%p338_p2)   ;;  %p375_p3 = scmp.lt.s32.totalorder (!%p338_p2), %s1587_s18, 1  ;;  %v2053_v1 = vld [vmem:[%s2525_s1] sm:$0xff] (!%p338_p2)   ;;  %v2148_v2 = vmov (!%p338_p2), 0.0   ;;  %v2058_v11 = vld [vmem:[%s2527_s3 + $0x50] sm:$0xff] (!%p338_p2)   ;;  %vm417_vm1 = vcmask (!%p338_p2), 130048  }
   0x6   : > { %341 = sbr.rel (%p338_p2) target bundleno = 1278 (0x4fe), region = 64  ;;  %1840 = vmatprep.subr.bf16.mxu0 (!%p338_p2), %v2052_v0  ;;  %1852 = vmatprep.subr.bf16.mxu1 (!%p338_p2), %v2148_v2  ;;  %v2054_v3 = vld [vmem:[%s2527_s3 + $0x40] sm:$0xff] (!%p338_p2)   ;;  %v2056_v4 = vld [vmem:[%s2527_s3 + $0x48] sm:$0xff] (!%p338_p2)   ;;  %vm395_vm0 = vsmask.f32 (!%p338_p2), 7424  ;;  %v2060_v18 = vld [vmem:[%s2527_s3 + $0x58] sm:$0xff] (!%p338_p2)  }
   0x7   : > { %1841 = vmatpush3.bf16.msra.mxu0 (!%p338_p2), %v2052_v0  ;;  %1853 = vmatpush3.bf16.msra.mxu1 (!%p338_p2), %v2054_v3  ;;  %v2055_v22 = vld [vmem:[%s2527_s3] sm:$0xff] (!%p338_p2)   ;;  %v2057_v23 = vld [vmem:[%s2527_s3 + $0x8] sm:$0xff] (!%p338_p2)   ;;  %v2059_v24 = vld [vmem:[%s2527_s3 + $0x10] sm:$0xff] (!%p338_p2)   ;;  %vm2149_vm2 = vmmov (!%p338_p2), 0   ;;  %s2487_s19 = smov (!%p338_p2), 0  }
   0x8   : > { %1846 = vmatprep.subr.bf16.mxu0 (!%p338_p2), %v2053_v1  ;;  %1854 = vmatprep.subr.bf16.mxu1 (!%p338_p2), %v2148_v2  ;;  %v2061_v25 = vld [vmem:[%s2527_s3 + $0x18] sm:$0xff] (!%p338_p2)   ;;  %v2062_v26 = vld [vmem:[%s2527_s3 + $0x60] sm:$0xff] (!%p338_p2)   ;;  %v2064_v28 = vld [vmem:[%s2527_s3 + $0x68] sm:$0xff] (!%p338_p2)  }
   0x9   : > { %v2063_v27 = vld [vmem:[%s2527_s3 + $0x20] sm:$0xff] (!%p338_p2)   ;;  %v2065_v29 = vld [vmem:[%s2527_s3 + $0x28] sm:$0xff] (!%p338_p2)   ;;  %v2066_v30 = vld [vmem:[%s2527_s3 + $0x70] sm:$0xff] (!%p338_p2)   ;;  %1868 = vmatprep.mubr.msk.bf16.mxu1 (!%p338_p2), %vm2149_vm2, %v2148_v2 }
   0xa   : > { %v2067_v31 = vld [vmem:[%s2527_s3 + $0x30] sm:$0xff] (!%p338_p2)   ;;  %v2068_v32 = vld [vmem:[%s2527_s3 + $0x78] sm:$0xff] (!%p338_p2)   ;;  %v1602_v34 = vld [vmem:[%s2526_s2] ss:$0 sm:$0xff] (!%p338_p2) }
   0xb   : > { %1855 = vmatpush3.bf16.msra.mxu1 (!%p338_p2), %v2056_v4  ;;  %v2069_v33 = vld [vmem:[%s2527_s3 + $0x38] sm:$0xff] (!%p338_p2)   ;;  %v2070_v51 = vld [vmem:[%s2527_s3 + $0x80] sm:$0xff] (!%p338_p2)   ;;  %v2071_v54 = vld [vmem:[%s2527_s3 + $0x88] sm:$0xff] (!%p338_p2)  }
   0xc   : > { %1856 = vmatprep.subr.bf16.mxu1 (!%p338_p2), %v2148_v2  ;;  %v2072_v55 = vld [vmem:[%s2527_s3 + $0x90] sm:$0xff] (!%p338_p2)   ;;  %v2073_v56 = vld [vmem:[%s2527_s3 + $0x98] sm:$0xff] (!%p338_p2)   ;;  %v2074_v57 = vld [vmem:[%s2527_s3 + $0xa0] sm:$0xff] (!%p338_p2)  }
   0xd   : > { %s2537_s18 = smov (!%p375_p3, %s1587_s18), 1  ;;  %v2075_v58 = vld [vmem:[%s2527_s3 + $0xa8] sm:$0xff]   ;;  %v2076_v59 = vld [vmem:[%s2527_s3 + $0xb0] sm:$0xff]   ;;  %v2077_v60 = vld [vmem:[%s2527_s3 + $0xb8] sm:$0xff]  }
   0xe   : > { %s1757_s25 = sshll.u32 %s2537_s18, 5  ;;  %s382_s28 = scalar_lea.vmem %s2535_s11, %s2537_s18  ;;  %v2078_v0 = vld [vmem:[%s2529_s5 + $0x40] sm:$0xff]   ;;  %v2080_v3 = vld [vmem:[%s2529_s5 + $0x48] sm:$0xff]  }
   0xf   : > { %s379_s12 = scalar_lea.vmem %s2524_s0, %s1757_s25  ;;  %1857 = vmatpush3.bf16.msra.mxu1 %v2058_v11  ;;  %v2081_v4 = vld [vmem:[%s2529_s5 + $0x8] sm:$0xff]  }
  0x10   : > { %v384_v5 = vld [vmem:[%s379_s12] sm:$0xff]  ;;  %v385_v6 = vld [vmem:[%s379_s12 + $0x8] sm:$0xff]  ;;  %v386_v7 = vld [vmem:[%s379_s12 + $0x10] sm:$0xff]  ;;  %1858 = vmatprep.subr.bf16.mxu1 %v2148_v2 }
  0x11   : > { %v387_v8 = vld [vmem:[%s379_s12 + $0x18] sm:$0xff]  ;;  %v388_v9 = vpack.c.bf16 %v385_v6, %v384_v5  ;;  %v2082_v5 = vld [vmem:[%s2529_s5 + $0x50] sm:$0xff]   ;;  %v2088_v11 = vld [vmem:[%s2529_s5 + $0x68] sm:$0xff]  }
  0x12   : > { %v389_v10 = vpack.c.bf16 %v387_v8, %v386_v7  ;;  %v2083_v6 = vld [vmem:[%s2529_s5 + $0x10] sm:$0xff]   ;;  %v2084_v7 = vld [vmem:[%s2529_s5 + $0x58] sm:$0xff]  }
  0x13   : > { %v397_v12 = vshrl.u32 %v388_v9, 16  ;;  %v399_v13 = vshll.u32 %v388_v9, 16  ;;  %1859 = vmatpush3.bf16.msra.mxu1 %v2060_v18  ;;  %v2085_v8 = vld [vmem:[%s2529_s5 + $0x18] sm:$0xff]  }
  0x14   : > { %v404_v14 = vshll.u32 %v389_v10, 16  ;;  %v408_v15 = vshrl.u32 %v389_v10, 16  ;;  %1860 = vmatprep.subr.bf16.mxu1 %v2148_v2 }
  0x15   : > { %v401_v16 = vrot.slane %v399_v13, 1  ;;  %v2090_v13 = vld [vmem:[%s2529_s5 + $0x70] sm:$0xff]  }
  0x16   : > { %v406_v17 = vrot.slane %v404_v14, 1  ;;  %v2091_v14 = vld [vmem:[%s2529_s5 + $0x30] sm:$0xff]  }
  0x17   : > { %v402_v19 = vor.u32 %v401_v16, %v397_v12  ;;  %1861 = vmatpush3.bf16.msra.mxu1 %v2062_v26  ;;  %v2089_v12 = vld [vmem:[%s2529_s5 + $0x28] sm:$0xff]   ;;  %v2093_v16 = vld [vmem:[%s2529_s5 + $0x38] sm:$0xff]  }
  0x18   : > { %v410_v20 = vor.u32 %v408_v15, %v406_v17  ;;  %1862 = vmatprep.subr.bf16.mxu1 %v2148_v2  ;;  %v2092_v15 = vld [vmem:[%s2529_s5 + $0x78] sm:$0xff]  }
  0x19   : > { %v407_v21 = vsel %vm395_vm0, %v402_v19, %v406_v17 }
  0x1a   : > { %1842 = vmatprep.mubr.msk.bf16.mxu0 %vm417_vm1, %v407_v21 }
  0x1b   : > { %1843 = vmatmul.mubr.msk.bf16.vlgmr.msra.gmra.mrb[0].mxu0 %vm417_vm1, %v410_v20  ;;  %1863 = vmatpush3.bf16.msra.mxu1 %v2064_v28  ;;  %v1659_v28 = vld [vmem:[%s2528_s4] ss:$0 sm:$0xff] }
  0x1c   : > { %1847 = vmatpush3.bf16.msra.mxu0 %v2053_v1  ;;  %1848 = vmatprep.mubr.msk.bf16.mxu0 %vm417_vm1, %v388_v9  ;;  %v2079_v1 = vld [vmem:[%s2529_s5] sm:$0xff]  }
  0x1d   : > { %1872 = vmatprep.subr.bf16.mxu0 %v2148_v2  ;;  %1864 = vmatprep.subr.bf16.mxu1 %v2148_v2  ;;  %v2086_v9 = vld [vmem:[%s2529_s5 + $0x60] sm:$0xff]  }
  0x1f   : > { %1865 = vmatpush3.bf16.msra.mxu1 %v2066_v30 }
  0x20   : > { %1866 = vmatprep.subr.bf16.mxu1 %v2148_v2 }
  0x23   : > { %1867 = vmatpush3.bf16.msra.mxu1 %v2068_v32 }
  0x24   : > { %1892 = vmatprep.subr.bf16.mxu1 %v2148_v2 }
  0x27   : > { %1849 = vmatmul.mubr.msk.bf16.vlgmr.msra.gmra.mrb[0].mxu0 %vm417_vm1, %v389_v10  ;;  %v2087_v10 = vld [vmem:[%s2529_s5 + $0x20] sm:$0xff]  }
  0x28   : > { %1873 = vmatpush3.bf16.msra.mxu0 %v2055_v22  ;;  %1888 = vmatprep.mubr.msk.bf16.mxu0 %vm2149_vm2, %v2148_v2 }
  0x29   : > { %1874 = vmatprep.subr.bf16.mxu0 %v2148_v2 }
  0x2c   : > { %1875 = vmatpush3.bf16.msra.mxu0 %v2057_v23 }
  0x2d   : > { %1876 = vmatprep.subr.bf16.mxu0 %v2148_v2 }
  0x30   : > { %1877 = vmatpush3.bf16.msra.mxu0 %v2059_v24 }
  0x31   : > { %1878 = vmatprep.subr.bf16.mxu0 %v2148_v2 }
  0x34   : > { %1879 = vmatpush3.bf16.msra.mxu0 %v2061_v25 }
  0x35   : > { %1880 = vmatprep.subr.bf16.mxu0 %v2148_v2 }
  0x38   : > { %1881 = vmatpush3.bf16.msra.mxu0 %v2063_v27 }
  0x39   : > { %1882 = vmatprep.subr.bf16.mxu0 %v2148_v2 }
  0x3c   : > { %1883 = vmatpush3.bf16.msra.mxu0 %v2065_v29 }
  0x3d   : > { %1884 = vmatprep.subr.bf16.mxu0 %v2148_v2 }
  0x40   : > { %1885 = vmatpush3.bf16.msra.mxu0 %v2067_v31 }
  0x41   : > { %1886 = vmatprep.subr.bf16.mxu0 %v2148_v2 }
  0x44   : > { %1887 = vmatpush3.bf16.msra.mxu0 %v2069_v33 }
  0x45   : > { %1912 = vmatprep.subr.bf16.mxu0 %v2148_v2 }
  0xfa   : > { %v1850_v35 = vpop.f32.mrb[0].mxu0 }
  0xfb   : > { %v541_v36 = vadd.f32 %v1850_v35, %v1602_v34  ;;  %v517_v37 = vpop.f32.mrb[1].mxu0 }
  0xfc   : > { %v539_v38 = vadd.f32 %v1602_v34, %v517_v37  ;;  %v1851_v39 = vpop.f32.mrb[2].mxu0 }
  0xfd   : > { %v545_v40 = vmax.f32 %v541_v36, 0.0  ;;  %v542_v41 = vadd.f32 %v1851_v39, %v1602_v34  ;;  %v520_v42 = vpop.f32.mrb[3].mxu0  ;;  %v2095_v39 = vld [vmem:[%s2529_s5 + $0xc0] sm:$0xff]  }
  0xfe   : > { %v543_v43 = vmax.f32 %v539_v38, 0.0  ;;  %v540_v44 = vadd.f32 %v1602_v34, %v520_v42  ;;  %v2094_v38 = vld [vmem:[%s2529_s5 + $0x80] sm:$0xff]  }
  0xff   : > { %549 = vst [vmem:[#allocation2 + $0x10] sm:$0xff] %v545_v40  ;;  %v546_v45 = vmax.f32 %v542_v41, 0.0 }
 0x100   : > { %547 = vst [vmem:[#allocation2] sm:$0xff] %v543_v43  ;;  %v544_v46 = vmax.f32 %v540_v44, 0.0  ;;  %v2096_v44 = vld [vmem:[%s2529_s5 + $0x88] sm:$0xff]  }
 0x101   : > { %550 = vst [vmem:[#allocation2 + $0x18] sm:$0x1f] %v546_v45  ;;  %v2097_v45 = vld [vmem:[%s2529_s5 + $0xc8] sm:$0xff]  }
 0x102   : > { %548 = vst [vmem:[#allocation2 + $0x8] sm:$0xff] %v544_v46  ;;  %v2098_v46 = vld [vmem:[%s2529_s5 + $0x90] sm:$0xff]  }
 0x108   : > { %v574_v47 = vld [vmem:[#allocation2 + $0x11] ss:$2 sm:$0x3f]  ;;  %v553_v48 = vld [vmem:[#allocation2 + $0x10] ss:$2 sm:$0x3f] }
 0x109   : > { %v572_v49 = vld [vmem:[#allocation2 + $0x1] ss:$2 sm:$0xff]  ;;  %v551_v50 = vld [vmem:[#allocation2] ss:$2 sm:$0xff] }
 0x10a   : > { %v575_v52 = vpack.c.bf16 %v574_v47, %v572_v49  ;;  %v554_v53 = vpack.c.bf16 %v553_v48, %v551_v50  ;;  %v772_v61 = vld [vmem:[#allocation2 + $0x2] ss:$2 sm:$0xff]  ;;  %v774_v62 = vld [vmem:[#allocation2 + $0x12] ss:$2 sm:$0x3f] }
 0x10b   : > { %v775_v63 = vpack.c.bf16 %v774_v62, %v772_v61  ;;  %v2099_v47 = vld [vmem:[%s2529_s5 + $0xd0] sm:$0xff]   ;;  %v2100_v48 = vld [vmem:[%s2529_s5 + $0x98] sm:$0xff]   ;;  %v2102_v50 = vld [vmem:[%s2529_s5 + $0xa0] sm:$0xff]  }
 0x10c   : > { %1869 = vmatmul.mubr.bf16.vlgmr.msra.gmra.mrb[0].mxu1 %v575_v52  ;;  %1889 = vmatmul.mubr.bf16.vlgmr.msra.gmra.mrb[4].mxu0 %v554_v53  ;;  %v2101_v49 = vld [vmem:[%s2529_s5 + $0xd8] sm:$0xff]   ;;  %v2104_v52 = vld [vmem:[%s2529_s5 + $0xa8] sm:$0xff]  }
 0x10d   : > { %1893 = vmatpush3.bf16.msra.mxu1 %v2070_v51  ;;  %1908 = vmatprep.mubr.msk.bf16.mxu1 %vm2149_vm2, %v2148_v2  ;;  %v2103_v51 = vld [vmem:[%s2529_s5 + $0xe0] sm:$0xff]   ;;  %v2105_v53 = vld [vmem:[%s2529_s5 + $0xe8] sm:$0xff]  }
 0x10e   : > { %1894 = vmatprep.subr.bf16.mxu1 %v2148_v2  ;;  %1928 = vmatprep.mubr.msk.bf16.mxu0 %vm2149_vm2, %v2148_v2 }
 0x10f   : > { %1913 = vmatpush3.bf16.msra.mxu0 %v2078_v0 }
 0x110   : > { %1914 = vmatprep.subr.bf16.mxu0 %v2148_v2 }
 0x111   : > { %1895 = vmatpush3.bf16.msra.mxu1 %v2071_v54  ;;  %v2106_v54 = vld [vmem:[%s2529_s5 + $0xb0] sm:$0xff]  }
 0x112   : > { %1896 = vmatprep.subr.bf16.mxu1 %v2148_v2 }
 0x113   : > { %1915 = vmatpush3.bf16.msra.mxu0 %v2080_v3 }
 0x114   : > { %1916 = vmatprep.subr.bf16.mxu0 %v2148_v2 }
 0x115   : > { %1897 = vmatpush3.bf16.msra.mxu1 %v2072_v55  ;;  %v2107_v55 = vld [vmem:[%s2529_s5 + $0xf0] sm:$0xff]  }
 0x116   : > { %1898 = vmatprep.subr.bf16.mxu1 %v2148_v2 }
 0x117   : > { %1917 = vmatpush3.bf16.msra.mxu0 %v2082_v5 }
 0x118   : > { %1918 = vmatprep.subr.bf16.mxu0 %v2148_v2 }
 0x119   : > { %1899 = vmatpush3.bf16.msra.mxu1 %v2073_v56  ;;  %v2108_v56 = vld [vmem:[%s2529_s5 + $0xb8] sm:$0xff]  }
 0x11a   : > { %1900 = vmatprep.subr.bf16.mxu1 %v2148_v2 }
 0x11b   : > { %1919 = vmatpush3.bf16.msra.mxu0 %v2084_v7 }
 0x11c   : > { %1920 = vmatprep.subr.bf16.mxu0 %v2148_v2 }
 0x11d   : > { %1901 = vmatpush3.bf16.msra.mxu1 %v2074_v57  ;;  %v2109_v57 = vld [vmem:[%s2529_s5 + $0xf8] sm:$0xff]  }
 0x11e   : > { %1902 = vmatprep.subr.bf16.mxu1 %v2148_v2 }
 0x11f   : > { %1921 = vmatpush3.bf16.msra.mxu0 %v2086_v9 }
 0x120   : > { %1922 = vmatprep.subr.bf16.mxu0 %v2148_v2 }
 0x121   : > { %1903 = vmatpush3.bf16.msra.mxu1 %v2075_v58 }
 0x122   : > { %1904 = vmatprep.subr.bf16.mxu1 %v2148_v2 }
 0x123   : > { %1923 = vmatpush3.bf16.msra.mxu0 %v2088_v11 }
 0x124   : > { %1924 = vmatprep.subr.bf16.mxu0 %v2148_v2 }
 0x125   : > { %1905 = vmatpush3.bf16.msra.mxu1 %v2076_v59 }
 0x126   : > { %1906 = vmatprep.subr.bf16.mxu1 %v2148_v2 }
 0x127   : > { %1925 = vmatpush3.bf16.msra.mxu0 %v2090_v13  ;;  %v1740_v13 = vld [vmem:[%s2530_s6] ss:$0 sm:$0xff] }
 0x128   : > { %1926 = vmatprep.subr.bf16.mxu0 %v2148_v2 }
 0x129   : > { %1907 = vmatpush3.bf16.msra.mxu1 %v2077_v60 }
 0x12a   : > { %1932 = vmatprep.subr.bf16.mxu1 %v2148_v2 }
 0x12b   : > { %1927 = vmatpush3.bf16.msra.mxu0 %v2092_v15 }
 0x12c   : > { %1909 = vmatmul.mubr.bf16.vlgmr.msra.gmra.mrb[4].mxu1 %v775_v63  ;;  %1952 = vmatprep.subr.bf16.mxu0 %v2148_v2 }
 0x12d   : > { %1948 = vmatprep.mubr.msk.bf16.mxu1 %vm2149_vm2, %v2148_v2  ;;  %1933 = vmatpush3.bf16.msra.mxu1 %v2079_v1 }
 0x12e   : > { %1934 = vmatprep.subr.bf16.mxu1 %v2148_v2 }
 0x131   : > { %1935 = vmatpush3.bf16.msra.mxu1 %v2081_v4 }
 0x132   : > { %1936 = vmatprep.subr.bf16.mxu1 %v2148_v2 }
 0x135   : > { %1937 = vmatpush3.bf16.msra.mxu1 %v2083_v6 }
 0x136   : > { %1938 = vmatprep.subr.bf16.mxu1 %v2148_v2 }
 0x139   : > { %1939 = vmatpush3.bf16.msra.mxu1 %v2085_v8 }
 0x13a   : > { %1940 = vmatprep.subr.bf16.mxu1 %v2148_v2 }
 0x13d   : > { %1941 = vmatpush3.bf16.msra.mxu1 %v2087_v10 }
 0x13e   : > { %1942 = vmatprep.subr.bf16.mxu1 %v2148_v2 }
 0x141   : > { %1943 = vmatpush3.bf16.msra.mxu1 %v2089_v12 }
 0x142   : > { %1944 = vmatprep.subr.bf16.mxu1 %v2148_v2 }
 0x145   : > { %1945 = vmatpush3.bf16.msra.mxu1 %v2091_v14 }
 0x146   : > { %1946 = vmatprep.subr.bf16.mxu1 %v2148_v2 }
 0x149   : > { %1947 = vmatpush3.bf16.msra.mxu1 %v2093_v16 }
 0x14a   : > { %1972 = vmatprep.subr.bf16.mxu1 %v2148_v2 }
 0x1df   : > { %v675_v17 = vpop.f32.mrb[0].mxu1  ;;  %v764_v18 = vpop.f32.mrb[4].mxu0 }
 0x1e0   : > { %v765_v19 = vadd.f32 %v764_v18, %v675_v17  ;;  %v1870_v20 = vpop.f32.mrb[1].mxu1  ;;  %v1890_v21 = vpop.f32.mrb[5].mxu0 }
 0x1e1   : > { %v678_v22 = vpop.f32.mrb[2].mxu1  ;;  %v767_v23 = vpop.f32.mrb[6].mxu0  ;;  %v2140_v21 = vmov 0.0  }
 0x1e2   : > { %v768_v24 = vadd.f32 %v767_v23, %v678_v22  ;;  %v1871_v25 = vpop.f32.mrb[3].mxu1  ;;  %v1891_v26 = vpop.f32.mrb[7].mxu0 }
 0x1ff   : > { %v875_v27 = vpop.f32.mrb[4].mxu1 }
 0x200   : > { %v882_v29 = vadd.f32 %v875_v27, %v765_v19  ;;  %v1910_v30 = vpop.f32.mrb[5].mxu1 }
 0x201   : > { %v878_v31 = vpop.f32.mrb[6].mxu1 }
 0x202   : > { %v891_v32 = vadd.f32 %v1659_v28, %v882_v29  ;;  %v883_v33 = vadd.f32 %v878_v31, %v768_v24  ;;  %v1911_v34 = vpop.f32.mrb[7].mxu1 }
 0x204   : > { %v893_v35 = vmax.f32 %v891_v32, 0.0  ;;  %v892_v36 = vadd.f32 %v1659_v28, %v883_v33 }
 0x206   : > { %895 = vst [vmem:[#allocation3] sm:$0xff] %v893_v35  ;;  %v894_v37 = vmax.f32 %v892_v36, 0.0 }
 0x208   : > { %896 = vst [vmem:[#allocation3 + $0x8] sm:$0x3f] %v894_v37 }
 0x20f   : > { %v916_v40 = vld [vmem:[#allocation3 + $0x1] ss:$2 sm:$0x3f]  ;;  %v897_v41 = vld [vmem:[#allocation3] ss:$2 sm:$0x3f] }
 0x210   : > { %v917_v42 = vpack.c.bf16 %v916_v40, %v916_v40  ;;  %v898_v43 = vpack.c.bf16 %v897_v41, %v897_v41  ;;  %v1112_v58 = vld [vmem:[#allocation3 + $0x2] ss:$2 sm:$0x3f]  ;;  %v1221_v59 = vld [vmem:[#allocation3 + $0x3] ss:$2 sm:$0x3f] }
 0x211   : > { %v1113_v60 = vpack.c.bf16 %v1112_v58, %v1112_v58  ;;  %v1222_v61 = vpack.c.bf16 %v1221_v59, %v1221_v59 }
 0x212   : > { %1929 = vmatmul.mubr.bf16.vlgmr.msra.gmra.mrb[8].mxu0 %v917_v42  ;;  %1949 = vmatmul.mubr.bf16.vlgmr.msra.gmra.mrb[8].mxu1 %v898_v43 }
 0x213   : > { %1953 = vmatpush3.bf16.msra.mxu0 %v2094_v38  ;;  %1973 = vmatpush3.bf16.msra.mxu1 %v2095_v39 }
 0x214   : > { %1954 = vmatprep.subr.bf16.mxu0 %v2148_v2  ;;  %1974 = vmatprep.subr.bf16.mxu1 %v2148_v2 }
 0x215   : > { %1968 = vmatprep.mubr.msk.bf16.mxu0 %vm2149_vm2, %v2148_v2  ;;  %1988 = vmatprep.mubr.msk.bf16.mxu1 %vm2149_vm2, %v2148_v2 }
 0x217   : > { %1955 = vmatpush3.bf16.msra.mxu0 %v2096_v44  ;;  %1975 = vmatpush3.bf16.msra.mxu1 %v2097_v45 }
 0x218   : > { %1956 = vmatprep.subr.bf16.mxu0 %v2148_v2  ;;  %1976 = vmatprep.subr.bf16.mxu1 %v2148_v2 }
 0x21b   : > { %1957 = vmatpush3.bf16.msra.mxu0 %v2098_v46  ;;  %1977 = vmatpush3.bf16.msra.mxu1 %v2099_v47 }
 0x21c   : > { %1958 = vmatprep.subr.bf16.mxu0 %v2148_v2  ;;  %1978 = vmatprep.subr.bf16.mxu1 %v2148_v2 }
 0x21f   : > { %1959 = vmatpush3.bf16.msra.mxu0 %v2100_v48  ;;  %1979 = vmatpush3.bf16.msra.mxu1 %v2101_v49 }
 0x220   : > { %1960 = vmatprep.subr.bf16.mxu0 %v2148_v2  ;;  %1980 = vmatprep.subr.bf16.mxu1 %v2148_v2 }
 0x223   : > { %1961 = vmatpush3.bf16.msra.mxu0 %v2102_v50  ;;  %1981 = vmatpush3.bf16.msra.mxu1 %v2103_v51 }
 0x224   : > { %1962 = vmatprep.subr.bf16.mxu0 %v2148_v2  ;;  %1982 = vmatprep.subr.bf16.mxu1 %v2148_v2 }
 0x227   : > { %1963 = vmatpush3.bf16.msra.mxu0 %v2104_v52  ;;  %1983 = vmatpush3.bf16.msra.mxu1 %v2105_v53 }
 0x228   : > { %1964 = vmatprep.subr.bf16.mxu0 %v2148_v2  ;;  %1984 = vmatprep.subr.bf16.mxu1 %v2148_v2 }
 0x22b   : > { %1965 = vmatpush3.bf16.msra.mxu0 %v2106_v54  ;;  %1985 = vmatpush3.bf16.msra.mxu1 %v2107_v55 }
 0x22c   : > { %1966 = vmatprep.subr.bf16.mxu0 %v2148_v2  ;;  %1986 = vmatprep.subr.bf16.mxu1 %v2148_v2 }
 0x22f   : > { %1967 = vmatpush3.bf16.msra.mxu0 %v2108_v56  ;;  %1987 = vmatpush3.bf16.msra.mxu1 %v2109_v57 }
 0x232   : > { %1969 = vmatmul.mubr.bf16.vlgmr.msra.gmra.mrb[12].mxu0 %v1113_v60  ;;  %1989 = vmatmul.mubr.bf16.vlgmr.msra.gmra.mrb[12].mxu1 %v1222_v61 }
 0x2e5   : > { %v1017_v62 = vpop.f32.mrb[8].mxu0  ;;  %v1105_v63 = vpop.f32.mrb[8].mxu1 }
 0x2e6   : > { %v1106_v0 = vadd.f32 %v1105_v63, %v1017_v62  ;;  %v1930_v1 = vpop.f32.mrb[9].mxu0  ;;  %v1950_v3 = vpop.f32.mrb[9].mxu1 }
 0x2e7   : > { %v1020_v4 = vpop.f32.mrb[10].mxu0  ;;  %v1108_v5 = vpop.f32.mrb[10].mxu1 }
 0x2e8   : > { %v1931_v6 = vpop.f32.mrb[11].mxu0  ;;  %v1951_v7 = vpop.f32.mrb[11].mxu1 }
 0x305   : > { %v1213_v8 = vpop.f32.mrb[12].mxu0  ;;  %v1322_v9 = vpop.f32.mrb[12].mxu1 }
 0x306   : > { %v1219_v10 = vadd.f32 %v1213_v8, %v1106_v0  ;;  %v1970_v11 = vpop.f32.mrb[13].mxu0  ;;  %v1990_v12 = vpop.f32.mrb[13].mxu1 }
 0x307   : > { %v1216_v14 = vpop.f32.mrb[14].mxu0  ;;  %v1325_v15 = vpop.f32.mrb[14].mxu1 }
 0x308   : > { %v1328_v16 = vadd.f32 %v1322_v9, %v1219_v10  ;;  %v1971_v17 = vpop.f32.mrb[15].mxu0  ;;  %v1991_v18 = vpop.f32.mrb[15].mxu1 }
 0x30a   : > { %v1336_v19 = vadd.f32 %v1740_v13, %v1328_v16 }
 0x30c   : > { %v1337_v20 = vmax.f32 %v1336_v19, 0.0 }
 0x30e   : > { %1338 = vst [vmem:[#allocation4] sm:$0x3f] %v1337_v20 }
 0x30f LB: >> { %v2150_v22 = vmov 0.0   ;;  %vm2151_vm3 = vmmov 0   ;;  %s1758_s20 = sshll.u32 %s2146_s19, 6  ;;  %s1346_s24 = scalar_lea.vmem [#allocation4], %s2146_s19  ;;  %s2146_s19 = sphi %s2487_s19, %s1344_s19   ;;  %v2142_v21 = vphi %v2140_v21, %v2141_v21  }
 0x310   : >> { %1992 = vmatprep.subr.bf16.mxu0 %v2150_v22  ;;  %2008 = vmatprep.mubr.msk.bf16.mxu0 %vm2151_vm3, %v2150_v22  ;;  %s1351_s23 = scalar_lea.vmem %s2531_s7, %s1758_s20  ;;  %s1344_s19 = sadd.s32 1, %s2146_s19  }
 0x311   : >> { %v2110_v23 = vld [vmem:[%s1351_s23] sm:$0xff]   ;;  %v2111_v24 = vld [vmem:[%s1351_s23 + $0x8] sm:$0xff]   ;;  %v2112_v25 = vld [vmem:[%s1351_s23 + $0x10] sm:$0xff]   ;;  %p1341_p4 = scmp.ge.s32.totalorder %s1344_s19, 6  }
 0x312   : >> { %1993 = vmatpush3.bf16.msra.mxu0 %v2110_v23  ;;  %v2113_v26 = vld [vmem:[%s1351_s23 + $0x18] sm:$0xff]   ;;  %v2114_v27 = vld [vmem:[%s1351_s23 + $0x20] sm:$0xff]   ;;  %v2115_v28 = vld [vmem:[%s1351_s23 + $0x28] sm:$0xff]   ;;  %vm1478_vm4 = vcmask (%p1341_p4), 261120  }
 0x313   : >> { %1994 = vmatprep.subr.bf16.mxu0 %v2150_v22  ;;  %v2116_v29 = vld [vmem:[%s1351_s23 + $0x30] sm:$0xff]   ;;  %v2117_v30 = vld [vmem:[%s1351_s23 + $0x38] sm:$0xff]   ;;  %v2118_v38 = vld [vmem:[%s2533_s9] sm:$0xff] (%p1341_p4)  }
 0x314   : > { %v2119_v39 = vld [vmem:[%s2533_s9 + $0x8] sm:$0xff] (%p1341_p4)   ;;  %v1457_v40 = vld [vmem:[%s2532_s8] sm:$0x1] (%p1341_p4) }
 0x315   : >> { %v1347_v31 = vld [vmem:[%s1346_s24] sm:$0x1] }
 0x316   : >> { %1995 = vmatpush3.bf16.msra.mxu0 %v2111_v24  ;;  %v1348_v32 = vpack.c.bf16 %v1347_v31, %v1347_v31  ;;  %v1465_v44 = vld [vmem:[%s2534_s10] sm:$0x1] (%p1341_p4) }
 0x317   : >> { %1996 = vmatprep.subr.bf16.mxu0 %v2150_v22 }
 0x31a   : >> { %1997 = vmatpush3.bf16.msra.mxu0 %v2112_v25 }
 0x31b   : >> { %1998 = vmatprep.subr.bf16.mxu0 %v2150_v22 }
 0x31e   : >> { %1999 = vmatpush3.bf16.msra.mxu0 %v2113_v26 }
 0x31f   : >> { %2000 = vmatprep.subr.bf16.mxu0 %v2150_v22 }
 0x322   : >> { %2001 = vmatpush3.bf16.msra.mxu0 %v2114_v27 }
 0x323   : >> { %2002 = vmatprep.subr.bf16.mxu0 %v2150_v22 }
 0x326   : >> { %2003 = vmatpush3.bf16.msra.mxu0 %v2115_v28 }
 0x327   : >> { %2004 = vmatprep.subr.bf16.mxu0 %v2150_v22 }
 0x32a   : >> { %2005 = vmatpush3.bf16.msra.mxu0 %v2116_v29 }
 0x32b   : >> { %2006 = vmatprep.subr.bf16.mxu0 %v2150_v22 }
 0x32e   : >> { %2007 = vmatpush3.bf16.msra.mxu0 %v2117_v30 }
 0x32f   : > { %2012 = vmatprep.subr.bf16.mxu0 (%p1341_p4), %v2148_v2 }
 0x331   : >> { %2009 = vmatmul.mubr.bf16.vlgmr.msra.gmra.mrb[0].mxu0 %v1348_v32 }
 0x332   : > { %2016 = vmatprep.mubr.msk.bf16.mxu0 (%p1341_p4), %vm2149_vm2, %v2148_v2  ;;  %2013 = vmatpush3.bf16.msra.mxu0 (%p1341_p4), %v2118_v38 }
 0x333   : > { %2014 = vmatprep.subr.bf16.mxu0 (%p1341_p4), %v2148_v2 }
 0x336   : > { %2015 = vmatpush3.bf16.msra.mxu0 (%p1341_p4), %v2119_v39 }
 0x401   : > { %1343 = sbr.rel (!%p1341_p4) target bundleno = 783 (0x30f), region = 117 }
 0x404   : >> { %v1450_v33 = vpop.f32.mrb[0].mxu0 }
 0x405   : >> { %v1456_v34 = vadd.f32 %v2142_v21, %v1450_v33   ;;  %v2010_v35 = vpop.f32.mrb[1].mxu0 }
 0x406   : >> { %v1453_v36 = vpop.f32.mrb[2].mxu0 }
 0x407   : >> { %v2011_v37 = vpop.f32.mrb[3].mxu0  ;;  %v2141_v21 = vmov %v1456_v34   ;;  %v1458_v41 = vadd.f32 (%p1341_p4), %v1457_v40, %v1456_v34 }
 0x409   : > { %v1459_v42 = vmax.f32 %v1458_v41, 0.0 }
 0x40b   : > { %v1460_v43 = vpack.c.bf16 %v1459_v42, %v1459_v42 }
 0x40d   : > { %2017 = vmatmul.mubr.msk.bf16.vlgmr.msra.gmra.mrb[0].mxu0 %vm1478_vm4, %v1460_v43 }
 0x4e0   : > { %v1516_v45 = vpop.f32.mrb[0].mxu0 }
 0x4e1   : > { %v1517_v46 = vadd.f32 %v1516_v45, %v1465_v44  ;;  %v2018_v47 = vpop.f32.mrb[1].mxu0 }
 0x4e2   : > { %v1519_v48 = vpop.f32.mrb[2].mxu0 }
 0x4e3   : > { %v1754_v49 = vmul.f32 -1.442695, %v1517_v46  ;;  %v2019_v50 = vpop.f32.mrb[3].mxu0 }
 0x4e5   : > { %2120 = vpow2.f32 %v1754_v49 }
 0x4ef   : > { %v2121_v51 = vpop.eup %2120 }
 0x4f0   : > { %v1525_v2 = vadd.f32 1.0, %v2121_v51 }
 0x4f2   : > { %2122 = vrcp.f32 %v1525_v2 }
 0x4fc   : > { %v2123_v52 = vpop.eup %2122 }
 0x4fd   : > { %1528 = vst [vmem:[%s382_s28] sm:$0x1] %v2123_v52 }
 0x4fe PF: > { %s21_s17 = sadd.s32 1, %s2138_s17  }
 0x4ff   : > { %p18_p5 = scmp.ge.s32.totalorder %s21_s17, 4  }
 0x501   :  { %20 = sbr.rel (!%p18_p5) target bundleno = 1 (0x1), region = 128 }

</bundles_post_ra>
